<compile_context>
chip_gen: v5e
topology: v5e:2x2
jax: 0.10.0
libtpu: 0.0.40
codegen_flags: <defaults>
</compile_context>

<pallas_src>
import functools

import jax
import jax.numpy as jnp
from jax.experimental import pallas as pl
from jax.experimental.pallas import tpu as pltpu


def _criterion_kernel(logits_ref, embeds_ref, tgt_col_ref, tgt_row_ref, out_ref,
                      *, temperature, eps, gamma, bf16_sim):
    logits = logits_ref[...].astype(jnp.float32)       # [B, C]
    embeds = embeds_ref[...].astype(jnp.float32)       # [B, D]
    tgt_col = tgt_col_ref[...]                         # [B, 1] int32
    tgt_row = tgt_row_ref[...]                         # [1, B] int32 (pre-transposed in wrapper)

    B, C = logits.shape
    inv_b = 1.0 / B

    # ---------------- cross-entropy (classification loss) ----------------
    # Fused gather: ce_i = lse - shifted[target]; no full log-prob matrix.
    onehot = tgt_col == jax.lax.broadcasted_iota(jnp.int32, (B, C), 1)   # [B, C] bool
    row_max = jnp.max(logits, axis=-1, keepdims=True)                    # [B, 1]
    shifted = logits - row_max                                           # [B, C]
    lse = jnp.log(jnp.sum(jnp.exp(shifted), axis=-1, keepdims=True))     # [B, 1]
    tgt_logit = jnp.sum(jnp.where(onehot, shifted, 0.0), axis=-1, keepdims=True)  # [B, 1]
    ce_i = lse - tgt_logit                                               # [B, 1]
    ce = jnp.sum(ce_i) * inv_b

    # ---------------- focal loss (gamma = 2.0) ----------------
    pt = jnp.exp(-ce_i)                                                  # [B, 1]
    one_minus_pt = 1.0 - pt
    if gamma == 2.0:
        mod = jnp.square(one_minus_pt)      # single VPU mul; no pow -> log/exp, NaN-safe
    else:
        mod = jnp.power(jnp.maximum(one_minus_pt, 0.0), gamma)
    focal = jnp.sum(mod * ce_i) * inv_b

    # ---------------- contrastive loss ----------------
    # L2 normalize (== x / max(||x||, 1e-12)) via rsqrt (EUP), then clamp.
    sumsq = jnp.sum(embeds * embeds, axis=-1, keepdims=True)             # [B, 1]
    en = embeds * jax.lax.rsqrt(jnp.maximum(sumsq, 1e-24))
    en = jnp.clip(en, -1.0 + eps, 1.0 - eps)

    # Fold 1/temperature into one operand (B*D mul instead of B*B);
    # contract last dims directly so there is no en.T relayout.
    en_scaled = en * (1.0 / temperature)
    if bf16_sim:
        lhs = en_scaled.astype(jnp.bfloat16)
        rhs = en.astype(jnp.bfloat16)
    else:
        lhs, rhs = en_scaled, en
    sim = jax.lax.dot_general(lhs, rhs, (((1,), (1,)), ((), ())),
                              preferred_element_type=jnp.float32)        # [B, B] f32

    labels_eq = tgt_col == tgt_row                                       # [B, B] bool, diag True
    rows = jax.lax.broadcasted_iota(jnp.int32, (B, B), 0)
    cols = jax.lax.broadcasted_iota(jnp.int32, (B, B), 1)
    off_diag = rows != cols

    n_pos = jnp.sum(labels_eq.astype(jnp.float32), axis=-1, keepdims=True) - 1.0   # [B, 1]
    # n_neg == (B - 1) - n_pos, so the negative mask is never materialized.
    valid = jnp.logical_and(n_pos > 0.0, n_pos < (B - 1.0)).astype(jnp.float32)    # [B, 1]

    max_sim = jnp.max(sim, axis=-1, keepdims=True)                       # [B, 1] (detached max)
    exp_nd = jnp.where(off_diag, jnp.exp(sim - max_sim), 0.0)            # off-diagonal exp only
    pos_exp_sum = jnp.sum(jnp.where(labels_eq, exp_nd, 0.0),
                          axis=-1, keepdims=True)                        # [B, 1]
    denom = jnp.sum(exp_nd, axis=-1, keepdims=True) + eps                # == pos + neg + eps
    per_sample = -jnp.log(pos_exp_sum / denom + eps) * valid             # [B, 1]
    n_valid = jnp.sum(valid)
    contr = jnp.sum(per_sample) / (n_valid + eps)   # 0 when no valid rows (matches torch early-return)

    # TODO(synk): the torch module logs a warning and zeroes the loss on NaN; the
    # logging side effect / NaN guard is not reproduced in-kernel.
    out_ref[0, 0] = ce + 0.05 * contr + 0.1 * focal


def enhanced_criterion(fusion_logits, fusion_embed, targets,
                       temperature=0.07, eps=1e-8, gamma=2.0, bf16_sim=False):
    """JAX/Pallas equivalent of EnhancedCriterion.forward (total scalar loss)."""
    B, C = fusion_logits.shape
    D = fusion_embed.shape[1]
    t = targets.astype(jnp.int32)
    tgt_col = t.reshape(B, 1)     # sublane orientation
    tgt_row = t.reshape(1, B)     # lane orientation -> no in-kernel transpose

    itemsize = max(jnp.dtype(fusion_logits.dtype).itemsize,
                   jnp.dtype(fusion_embed.dtype).itemsize)
    cost = pl.CostEstimate(
        flops=int(2 * B * B * D + 6 * B * C + 10 * B * B + 4 * B * D),
        transcendentals=int(B * C + B * B + 3 * B),
        bytes_accessed=int((B * C + B * D) * itemsize + 2 * B * 4 + 4),
    )

    kernel = functools.partial(_criterion_kernel, temperature=temperature,
                               eps=eps, gamma=gamma, bf16_sim=bf16_sim)

    # TODO(synk): for production batch/class sizes, tile B (and C) with a grid +
    # f32 scratch accumulators (BlockSpec double-buffering overlaps DMA with
    # compute): mark the batch axis "parallel" (shards across v7x's 2 TCs, no-op
    # on v5e/v6e), set vmem_limit_bytes via pltpu.CompilerParams, size tiles so
    # 2 inputs x 2 buffers + f32 sim scratch stay under ~32 MiB scoped VMEM on
    # v7x (roughly half the v6e tile), go 512-1024 rows on v6e, keep sim-matmul
    # N tiles 128-aligned on v5e / 256-aligned on v6e+, and use bf16_sim=True.
    # At these demo shapes a single resident block is cheapest.
    out = pl.pallas_call(
        kernel,
        out_shape=jax.ShapeDtypeStruct((1, 1), jnp.float32),
        in_specs=[
            pl.BlockSpec((B, C), lambda: (0, 0)),
            pl.BlockSpec((B, D), lambda: (0, 0)),
            pl.BlockSpec((B, 1), lambda: (0, 0)),
            pl.BlockSpec((1, B), lambda: (0, 0)),
        ],
        out_specs=pl.BlockSpec(memory_space=pltpu.MemorySpace.SMEM),
        cost_estimate=cost,
    )(fusion_logits, fusion_embed, tgt_col, tgt_row)
    return out[0, 0]


def _reference(fusion_logits, fusion_embed, targets,
               temperature=0.07, eps=1e-8, gamma=2.0):
    """Pure-JAX reference mirroring the PyTorch module semantics."""
    logits = fusion_logits.astype(jnp.float32)
    embeds = fusion_embed.astype(jnp.float32)
    B, C = logits.shape
    logp = jax.nn.log_softmax(logits, axis=-1)
    ce_i = -jnp.take_along_axis(logp, targets[:, None], axis=1)[:, 0]
    ce = jnp.mean(ce_i)
    pt = jnp.exp(-ce_i)
    focal = jnp.mean(((1.0 - pt) ** gamma) * ce_i)

    norm = jnp.linalg.norm(embeds, axis=1, keepdims=True)
    en = embeds / jnp.maximum(norm, 1e-12)
    en = jnp.clip(en, -1.0 + eps, 1.0 - eps)
    sim = (en @ en.T) / temperature
    eq = targets[:, None] == targets[None, :]
    diag = jnp.eye(B, dtype=bool)
    pos = eq & ~diag
    neg = ~eq & ~diag
    valid = (pos.sum(1) > 0) & (neg.sum(1) > 0)
    max_sim = jnp.max(sim, axis=1, keepdims=True)
    e = jnp.exp(sim - max_sim)
    ps = jnp.sum(e * pos, axis=1)
    ns = jnp.sum(e * neg, axis=1)
    per = -jnp.log(ps / (ps + ns + eps) + eps) * valid.astype(jnp.float32)
    contr = jnp.sum(per) / (jnp.sum(valid) + eps)
    return ce + 0.05 * contr + 0.1 * focal


if __name__ == "__main__":
    key = jax.random.PRNGKey(0)
    k1, k2, k3 = jax.random.split(key, 3)

    B, C, D = 8, 4, 32   # batch, num classes, fusion embedding dim
    fusion_logits = jax.random.normal(k1, (B, C), dtype=jnp.float32)
    fusion_embed = jax.random.normal(k2, (B, D), dtype=jnp.float32)
    targets = jax.random.randint(k3, (B,), 0, C, dtype=jnp.int32)

    loss = enhanced_criterion(fusion_logits, fusion_embed, targets)
    loss = jax.block_until_ready(loss)

    ref = _reference(fusion_logits, fusion_embed, targets)
    assert jnp.isfinite(loss), "kernel produced non-finite loss"
    assert abs(float(loss) - float(ref)) < 1e-4, (float(loss), float(ref))

    print("KERNEL_OK")
</pallas_src>

<mosaic_0001>
module attributes {stable_mosaic.version = 11 : i64} {
  func.func @_criterion_kernel(%arg0: memref<8x4xf32, #tpu.memory_space<vmem>>, %arg1: memref<8x32xf32, #tpu.memory_space<vmem>>, %arg2: memref<8x1xi32, #tpu.memory_space<vmem>>, %arg3: memref<1x8xi32, #tpu.memory_space<vmem>>, %arg4: memref<1x1xf32, #tpu.memory_space<smem>>) attributes {dimension_semantics = [], scalar_prefetch = 0 : i64, scratch_operands = 0 : i64, tpu.core_type = #tpu.core_type<tc>} {
    %c0 = arith.constant 0 : index
    %c0_0 = arith.constant 0 : index
    %0 = vector.load %arg0[%c0, %c0_0] : memref<8x4xf32, #tpu.memory_space<vmem>>, vector<8x4xf32>
    %c0_1 = arith.constant 0 : index
    %c0_2 = arith.constant 0 : index
    %1 = vector.load %arg1[%c0_1, %c0_2] : memref<8x32xf32, #tpu.memory_space<vmem>>, vector<8x32xf32>
    %c0_3 = arith.constant 0 : index
    %c0_4 = arith.constant 0 : index
    %2 = vector.load %arg2[%c0_3, %c0_4] : memref<8x1xi32, #tpu.memory_space<vmem>>, vector<8x1xi32>
    %c0_5 = arith.constant 0 : index
    %c0_6 = arith.constant 0 : index
    %3 = vector.load %arg3[%c0_5, %c0_6] : memref<1x8xi32, #tpu.memory_space<vmem>>, vector<1x8xi32>
    %4 = tpu.iota {dimensions = array<i32: 1>} : vector<8x4xi32>
    %5 = vector.broadcast %2 : vector<8x1xi32> to vector<8x4xi32>
    %6 = arith.cmpi eq, %5, %4 : vector<8x4xi32>
    %cst = arith.constant dense<0xFF800000> : vector<8xf32>
    %7 = vector.multi_reduction <maximumf>, %0, %cst [1] : vector<8x4xf32> to vector<8xf32>
    %8 = vector.shape_cast %7 : vector<8xf32> to vector<8x1xf32>
    %9 = vector.broadcast %8 : vector<8x1xf32> to vector<8x4xf32>
    %10 = arith.subf %0, %9 : vector<8x4xf32>
    %11 = math.exp %10 : vector<8x4xf32>
    %cst_7 = arith.constant dense<0.000000e+00> : vector<8xf32>
    %12 = vector.multi_reduction <add>, %11, %cst_7 [1] : vector<8x4xf32> to vector<8xf32>
    %13 = vector.shape_cast %12 : vector<8xf32> to vector<8x1xf32>
    %14 = math.log %13 : vector<8x1xf32>
    %cst_8 = arith.constant 0.000000e+00 : f32
    %15 = vector.broadcast %cst_8 : f32 to vector<8x4xf32>
    %16 = arith.select %6, %10, %15 : vector<8x4xi1>, vector<8x4xf32>
    %cst_9 = arith.constant dense<0.000000e+00> : vector<8xf32>
    %17 = vector.multi_reduction <add>, %16, %cst_9 [1] : vector<8x4xf32> to vector<8xf32>
    %18 = vector.shape_cast %17 : vector<8xf32> to vector<8x1xf32>
    %19 = arith.subf %14, %18 : vector<8x1xf32>
    %20 = vector.shape_cast %19 : vector<8x1xf32> to vector<1x8x1xf32>
    %cst_10 = arith.constant dense<0.000000e+00> : vector<1xf32>
    %21 = vector.multi_reduction <add>, %20, %cst_10 [1, 2] : vector<1x8x1xf32> to vector<1xf32>
    %22 = vector.shape_cast %21 : vector<1xf32> to vector<1x1x1xf32>
    %23 = vector.extract %22[0, 0, 0] : f32 from vector<1x1x1xf32>
    %cst_11 = arith.constant 1.250000e-01 : f32
    %24 = arith.mulf %23, %cst_11 : f32
    %cst_12 = arith.constant 0.000000e+00 : f32
    %25 = vector.broadcast %cst_12 : f32 to vector<8x1xf32>
    %26 = arith.subf %25, %19 : vector<8x1xf32>
    %27 = math.exp %26 : vector<8x1xf32>
    %cst_13 = arith.constant 1.000000e+00 : f32
    %28 = vector.broadcast %cst_13 : f32 to vector<8x1xf32>
    %29 = arith.subf %28, %27 : vector<8x1xf32>
    %30 = arith.mulf %29, %29 : vector<8x1xf32>
    %31 = arith.mulf %30, %19 : vector<8x1xf32>
    %32 = vector.shape_cast %31 : vector<8x1xf32> to vector<1x8x1xf32>
    %cst_14 = arith.constant dense<0.000000e+00> : vector<1xf32>
    %33 = vector.multi_reduction <add>, %32, %cst_14 [1, 2] : vector<1x8x1xf32> to vector<1xf32>
    %34 = vector.shape_cast %33 : vector<1xf32> to vector<1x1x1xf32>
    %35 = vector.extract %34[0, 0, 0] : f32 from vector<1x1x1xf32>
    %cst_15 = arith.constant 1.250000e-01 : f32
    %36 = arith.mulf %35, %cst_15 : f32
    %37 = arith.mulf %1, %1 : vector<8x32xf32>
    %cst_16 = arith.constant dense<0.000000e+00> : vector<8xf32>
    %38 = vector.multi_reduction <add>, %37, %cst_16 [1] : vector<8x32xf32> to vector<8xf32>
    %39 = vector.shape_cast %38 : vector<8xf32> to vector<8x1xf32>
    %cst_17 = arith.constant 1.000000e-24 : f32
    %40 = vector.broadcast %cst_17 : f32 to vector<8x1xf32>
    %41 = arith.maximumf %39, %40 : vector<8x1xf32>
    %42 = math.rsqrt %41 : vector<8x1xf32>
    %43 = vector.broadcast %42 : vector<8x1xf32> to vector<8x32xf32>
    %44 = arith.mulf %1, %43 : vector<8x32xf32>
    %cst_18 = arith.constant -1.000000e+00 : f32
    %cst_19 = arith.constant 1.000000e+00 : f32
    %45 = vector.broadcast %cst_18 : f32 to vector<8x32xf32>
    %46 = arith.maximumf %45, %44 : vector<8x32xf32>
    %47 = vector.broadcast %cst_19 : f32 to vector<8x32xf32>
    %48 = arith.minimumf %47, %46 : vector<8x32xf32>
    %cst_20 = arith.constant 14.2857141 : f32
    %49 = vector.broadcast %cst_20 : f32 to vector<8x32xf32>
    %50 = arith.mulf %48, %49 : vector<8x32xf32>
    %cst_21 = arith.constant dense<0.000000e+00> : vector<8x8xf32>
    %51 = tpu.matmul %50, %48, %cst_21 {dimension_numbers = #tpu.dot_dimension_numbers<[1], [1], [0], [0], [0, 0, 1, 0], [], []>} : vector<8x32xf32>, vector<8x32xf32>, vector<8x8xf32> -> vector<8x8xf32>
    %52 = vector.broadcast %2 : vector<8x1xi32> to vector<8x8xi32>
    %53 = vector.broadcast %3 : vector<1x8xi32> to vector<8x8xi32>
    %54 = arith.cmpi eq, %52, %53 : vector<8x8xi32>
    %55 = tpu.iota {dimensions = array<i32: 0>} : vector<8x8xi32>
    %56 = tpu.iota {dimensions = array<i32: 1>} : vector<8x8xi32>
    %57 = arith.cmpi ne, %55, %56 : vector<8x8xi32>
    %58 = arith.extui %54 : vector<8x8xi1> to vector<8x8xi32>
    %59 = arith.sitofp %58 : vector<8x8xi32> to vector<8x8xf32>
    %cst_22 = arith.constant dense<0.000000e+00> : vector<8xf32>
    %60 = vector.multi_reduction <add>, %59, %cst_22 [1] : vector<8x8xf32> to vector<8xf32>
    %61 = vector.shape_cast %60 : vector<8xf32> to vector<8x1xf32>
    %cst_23 = arith.constant 1.000000e+00 : f32
    %62 = vector.broadcast %cst_23 : f32 to vector<8x1xf32>
    %63 = arith.subf %61, %62 : vector<8x1xf32>
    %cst_24 = arith.constant 0.000000e+00 : f32
    %64 = vector.broadcast %cst_24 : f32 to vector<8x1xf32>
    %65 = arith.cmpf ogt, %63, %64 : vector<8x1xf32>
    %cst_25 = arith.constant 7.000000e+00 : f32
    %66 = vector.broadcast %cst_25 : f32 to vector<8x1xf32>
    %67 = arith.cmpf olt, %63, %66 : vector<8x1xf32>
    %68 = arith.andi %65, %67 : vector<8x1xi1>
    %69 = arith.extui %68 : vector<8x1xi1> to vector<8x1xi32>
    %70 = arith.sitofp %69 : vector<8x1xi32> to vector<8x1xf32>
    %cst_26 = arith.constant dense<0xFF800000> : vector<8xf32>
    %71 = vector.multi_reduction <maximumf>, %51, %cst_26 [1] : vector<8x8xf32> to vector<8xf32>
    %72 = vector.shape_cast %71 : vector<8xf32> to vector<8x1xf32>
    %73 = vector.broadcast %72 : vector<8x1xf32> to vector<8x8xf32>
    %74 = arith.subf %51, %73 : vector<8x8xf32>
    %75 = math.exp %74 : vector<8x8xf32>
    %cst_27 = arith.constant 0.000000e+00 : f32
    %76 = vector.broadcast %cst_27 : f32 to vector<8x8xf32>
    %77 = arith.select %57, %75, %76 : vector<8x8xi1>, vector<8x8xf32>
    %cst_28 = arith.constant 0.000000e+00 : f32
    %78 = vector.broadcast %cst_28 : f32 to vector<8x8xf32>
    %79 = arith.select %54, %77, %78 : vector<8x8xi1>, vector<8x8xf32>
    %cst_29 = arith.constant dense<0.000000e+00> : vector<8xf32>
    %80 = vector.multi_reduction <add>, %79, %cst_29 [1] : vector<8x8xf32> to vector<8xf32>
    %81 = vector.shape_cast %80 : vector<8xf32> to vector<8x1xf32>
    %cst_30 = arith.constant dense<0.000000e+00> : vector<8xf32>
    %82 = vector.multi_reduction <add>, %77, %cst_30 [1] : vector<8x8xf32> to vector<8xf32>
    %83 = vector.shape_cast %82 : vector<8xf32> to vector<8x1xf32>
    %cst_31 = arith.constant 9.99999993E-9 : f32
    %84 = vector.broadcast %cst_31 : f32 to vector<8x1xf32>
    %85 = arith.addf %83, %84 : vector<8x1xf32>
    %86 = arith.divf %81, %85 : vector<8x1xf32>
    %cst_32 = arith.constant 9.99999993E-9 : f32
    %87 = vector.broadcast %cst_32 : f32 to vector<8x1xf32>
    %88 = arith.addf %86, %87 : vector<8x1xf32>
    %89 = math.log %88 : vector<8x1xf32>
    %cst_33 = arith.constant 0.000000e+00 : f32
    %90 = vector.broadcast %cst_33 : f32 to vector<8x1xf32>
    %91 = arith.subf %90, %89 : vector<8x1xf32>
    %92 = arith.mulf %91, %70 : vector<8x1xf32>
    %93 = vector.shape_cast %70 : vector<8x1xf32> to vector<1x8x1xf32>
    %cst_34 = arith.constant dense<0.000000e+00> : vector<1xf32>
    %94 = vector.multi_reduction <add>, %93, %cst_34 [1, 2] : vector<1x8x1xf32> to vector<1xf32>
    %95 = vector.shape_cast %94 : vector<1xf32> to vector<1x1x1xf32>
    %96 = vector.extract %95[0, 0, 0] : f32 from vector<1x1x1xf32>
    %97 = vector.shape_cast %92 : vector<8x1xf32> to vector<1x8x1xf32>
    %cst_35 = arith.constant dense<0.000000e+00> : vector<1xf32>
    %98 = vector.multi_reduction <add>, %97, %cst_35 [1, 2] : vector<1x8x1xf32> to vector<1xf32>
    %99 = vector.shape_cast %98 : vector<1xf32> to vector<1x1x1xf32>
    %100 = vector.extract %99[0, 0, 0] : f32 from vector<1x1x1xf32>
    %cst_36 = arith.constant 9.99999993E-9 : f32
    %101 = arith.addf %96, %cst_36 : f32
    %102 = arith.divf %100, %101 : f32
    %cst_37 = arith.constant 5.000000e-02 : f32
    %103 = arith.mulf %cst_37, %102 : f32
    %104 = arith.addf %24, %103 : f32
    %cst_38 = arith.constant 1.000000e-01 : f32
    %105 = arith.mulf %cst_38, %36 : f32
    %106 = arith.addf %104, %105 : f32
    %c0_39 = arith.constant 0 : index
    %c0_40 = arith.constant 0 : index
    %107 = memref.load %arg4[%c0_39, %c0_40] : memref<1x1xf32, #tpu.memory_space<smem>>
    memref.store %106, %arg4[%c0_39, %c0_40] : memref<1x1xf32, #tpu.memory_space<smem>>
    return
  }
}

</mosaic_0001>

<bundles_post_ra>
// kernel: tpu_custom_call.1
= control target key start
LH: loop header
LB: loop body
LE: loop exit
PB: predicated region body
PF: predicated region fallthrough
CT: control target
= control target key end

     0   :  { %vm75_vm0 = vcmask 261120   ;;  %s352_s0 = inlined_call_operand.vmem [shape: f32[8,4], index: 0, kind: input, shape index: {}]   ;;  %s353_s1 = inlined_call_operand.vmem [shape: f32[8,32], index: 1, kind: input, shape index: {}]   ;;  %s354_s2 = inlined_call_operand.vmem [shape: s32[8,1], index: 2, kind: input, shape index: {}]   ;;  %s355_s3 = inlined_call_operand.vmem [shape: s32[1,8], index: 3, kind: input, shape index: {}]   ;;  %s356_s4 = inlined_call_operand.hbm [shape: f32[1,1], index: 4, kind: output, shape index: {}]  }
   0x1   :  { %v19_v0 = vld [vmem:[%s353_s1] sm:$0xff] }
   0x2   :  { %v74_v1 = vmul.f32 %v19_v0, %v19_v0 }
   0x3   :  { %9 = vsyncpa [#allocation3], 0  ;;  %v18_v3 = vld [vmem:[%s352_s0] sm:$0xff]  ;;  %vm28_vm1 = vcmask 31744   ;;  %v283_v5 = vmov 0   ;;  %v22_v24 = vlaneseq  ;;  %vm127_vm5 = vcmask 64512  }
   0x4   :  { %v76_v2 = vsel %vm75_vm0, %v74_v1, 0.0  ;;  %v29_v4 = vsel %vm28_vm1, %v18_v3, -inf  ;;  %250 = vset.pattern.permute.xlu1 %v283_v5  ;;  %v20_v6 = vld [vmem:[%s354_s2] sm:$0xff]  ;;  %251 = vset.pattern.permute.xlu0 %v283_v5  ;;  %v284_v29 = vmov 0.0   ;;  %vm45_vm8 = vcmask 7168   ;;  %s221_s5 = sshll.u32 %s356_s4, 4  ;;  %s222_s5 = int_to_ptr.hbm [resolvable:$true] %s221_s5 }
   0x5   :  { %77 = vadd.xlane.f32.xlu0 %v76_v2  ;;  %25 = vperm.xlu1 %250, %v20_v6   ;;  %v252_v25 = vld [vmem:[%s355_s3] ss:$0 sm:$0xff]  ;;  %v23_v26 = vand.u32 127, %v22_v24  ;;  %v123_v50 = vshrl.u32 %v22_v24, 7  ;;  %s285_s9 = smov [#allocation2]  }
   0x7   :  { %vm124_vm12 = vcmp.ne.s32.totalorder %v123_v50, %v23_v26 }
   0xd   :  { %30 = vmax.xlane.f32.xlu0 %v29_v4 }
  0x77   :  { %v26_v27 = vpop.permute.xlu1 %25 }
  0x78   :  { %v78_v7 = vpop.xlane.xlu0 %77  ;;  %vm121_vm6 = vcmp.eq.s32.totalorder %v26_v27, %v252_v25  ;;  %vm27_vm7 = vcmp.eq.s32.totalorder %v26_v27, %v23_v26 }
  0x79   :  { %v79_v8 = vmax.f32 %v78_v7, 1e-24  ;;  %v234_v30 = vsel %vm121_vm6, 1.0, %v284_v29 }
  0x7a   :  { %v128_v32 = vsel %vm127_vm5, %v234_v30, 0.0 }
  0x7b   :  { %253 = vrsqrt.f32 %v79_v8  ;;  %vm86_vm3 = vweird.f32 %v79_v8  ;;  %129 = vadd.xlane.f32.xlu0 %v128_v32 }
  0x80   :  { %v31_v9 = vpop.xlane.xlu0 %30 }
  0x81   :  { %v254_v10 = vpop.eup %253  ;;  %v32_v11 = vsub.f32 %v18_v3, %v31_v9 }
  0x82   :  { %v81_v12 = vmul.f32 %v254_v10, %v79_v8  ;;  %vm87_vm2 = vweird.f32 %v254_v10 }
  0x83   :  { %v33_v13 = vmul.f32 1.442695, %v32_v11  ;;  %vm88_vm4 = vmor %vm86_vm3, %vm87_vm2  ;;  %v40_v28 = vsel %vm27_vm7, %v32_v11, 0.0 }
  0x84   :  { %v82_v14 = vmul.f32 %v254_v10, %v81_v12  ;;  %v41_v31 = vsel %vm28_vm1, %v40_v28, 0.0 }
  0x85   :  { %255 = vpow2.f32 %v33_v13  ;;  %42 = vadd.xlane.f32.xlu2 %v41_v31 }
  0x86   :  { %v83_v15 = vmul.f32 0.5, %v82_v14 }
  0x88   :  { %v84_v16 = vsub.f32 1.5, %v83_v15 }
  0x8a   :  { %v85_v17 = vmul.f32 %v254_v10, %v84_v16 }
  0x8b   :  { %v256_v18 = vpop.eup %255 }
  0x8c   :  { %v89_v19 = vsel %vm88_vm4, %v254_v10, %v85_v17  ;;  %v35_v20 = vsel %vm28_vm1, %v256_v18, 0.0 }
  0x8d   :  { %v90_v21 = vmul.f32 %v89_v19, %v19_v0  ;;  %36 = vadd.xlane.f32.xlu1 %v35_v20 }
  0x8f   :  { %v231_v22 = vclamps-f32 %v90_v21, 1.0 }
  0x91   :  { %v93_v23 = vmul.f32 14.285714, %v231_v22  ;;  %232 = vmatpush.xpose.msk.msra.mxu0 %vm75_vm0, %v231_v22 }
  0x94   :  { %233 = vmatmul.msk.f32.vlgmr.msra.gmra.mxu0 %vm75_vm0, %v93_v23 }
  0xee   :  { %v130_v39 = vpop.xlane.xlu0 %129 }
  0xef   :  { %v235_v41 = vadd.f32 -1.0, %v130_v39 }
  0xf1   :  { %vm132_vm9 = vcmp.gt.f32.partialorder %v235_v41, 0.0  ;;  %vm133_vm10 = vcmp.lt.f32.partialorder %v235_v41, 7.0 }
  0xf2   :  { %vm134_vm11 = vmand %vm132_vm9, %vm133_vm10 }
  0xf3   :  { %v333_v43 = vsel %vm134_vm11, 1.0, %v284_v29 }
  0xf4   :  { %v172_v44 = vsel %vm45_vm8, %v333_v43, 0.0 }
  0xf8   :  { %v43_v38 = vpop.xlane.xlu2 %42 }
 0x100   :  { %v37_v35 = vpop.xlane.xlu1 %36 }
 0x101   :  { %257 = vlog2.f32 %v37_v35 }
 0x107   :  { %v258_v36 = vpop.eup %257 }
 0x108   :  { %v39_v37 = vmul.f32 0.6931472, %v258_v36 }
 0x10a   :  { %v44_v40 = vsub.f32 %v39_v37, %v43_v38 }
 0x10c   :  { %v46_v42 = vsel %vm45_vm8, %v44_v40, 0.0  ;;  %v57_v45 = vsub.f32 0.0, %v44_v40 }
 0x10d   :  { %47 = vadd.xlane.f32.xlu0 %v46_v42 }
 0x10e   :  { %v58_v46 = vmul.f32 1.442695, %v57_v45 }
 0x110   :  { %259 = vpow2.f32 %v58_v46 }
 0x111   :  { %v117_v33 = vpop.f32.mrf.mxu0 }
 0x112   :  { %v137_v34 = vsel %vm127_vm5, %v117_v33, -inf }
 0x113   :  { %138 = vmax.xlane.f32.xlu2 %v137_v34 }
 0x115   :  { %173 = vadd.xlane.f32.xlu0 %v172_v44 }
 0x116   :  { %v260_v51 = vpop.eup %259 }
 0x117   :  { %v60_v52 = vsub.f32 1.0, %v260_v51 }
 0x119   :  { %v61_v56 = vmul.f32 %v60_v52, %v60_v52 }
 0x11b   :  { %v62_v57 = vmul.f32 %v61_v56, %v44_v40 }
 0x11d   :  { %v63_v58 = vsel %vm45_vm8, %v62_v57, 0.0 }
 0x180   :  { %v48_v61 = vpop.xlane.xlu0 %47 }
 0x181   :  { %v49_v62 = vrot.slane %v48_v61, 4 }
 0x183   :  { %v50_v63 = vadd.f32 %v49_v62, %v48_v61 }
 0x185   :  { %v51_v0 = vrot.slane %v50_v63, 2 }
 0x186   :  { %v139_v47 = vpop.xlane.xlu2 %138 }
 0x187   :  { %v140_v48 = vsub.f32 %v117_v33, %v139_v47  ;;  %v52_v1 = vadd.f32 %v51_v0, %v50_v63 }
 0x188   :  { %v174_v4 = vpop.xlane.xlu0 %173 }
 0x189   :  { %v141_v49 = vmul.f32 1.442695, %v140_v48  ;;  %v53_v2 = vrot.slane %v52_v1, 1  ;;  %v175_v5 = vrot.slane %v174_v4, 4 }
 0x18b   :  { %261 = vpow2.f32 %v141_v49  ;;  %v54_v3 = vadd.f32 %v53_v2, %v52_v1  ;;  %v176_v8 = vadd.f32 %v175_v5, %v174_v4 }
 0x18d   :  { %237 = vpush %v54_v3  ;;  %v177_v9 = vrot.slane %v176_v8, 2 }
 0x18f   :  { %v178_v16 = vadd.f32 %v177_v9, %v176_v8 }
 0x191   :  { %v262_v53 = vpop.eup %261  ;;  %v179_v23 = vrot.slane %v178_v16, 1 }
 0x192   :  { %v143_v54 = vsel %vm124_vm12, %v262_v53, 0.0 }
 0x193   :  { %v148_v55 = vsel %vm127_vm5, %v143_v54, 0.0  ;;  %v144_v59 = vsel %vm121_vm6, %v143_v54, 0.0  ;;  %v180_v31 = vadd.f32 %v179_v23, %v178_v16 }
 0x194   :  { %149 = vadd.xlane.f32.xlu2 %v148_v55  ;;  %v145_v60 = vsel %vm127_vm5, %v144_v59, 0.0 }
 0x19c   :  { %64 = vadd.xlane.f32.xlu2 %v63_v58 }
 0x1a4   :  { %146 = vadd.xlane.f32.xlu2 %v145_v60 }
 0x1be   :  { %s343_s2 = spop %237 }
 0x1bf   :  { %s56_s27 = smul.f32 0.125, %s343_s2 }
 0x207   :  { %v150_v6 = vpop.xlane.xlu2 %149 }
 0x208   :  { %v151_v7 = vadd.f32 1e-08, %v150_v6 }
 0x20a   :  { %263 = vrcp.f32 %v151_v7  ;;  %v163_v18 = vand.u32 2147483648, %v151_v7  ;;  %v161_v20 = vand.u32 2147483647, %v151_v7  ;;  %vm157_vm14 = vweird.f32 %v151_v7 }
 0x20c   :  { %v164_v24 = vor.u32 1.1754944e-38, %v163_v18  ;;  %vm162_vm0 = vcmp.eq.f32.partialorder %v161_v20, 8.507059e+37 }
 0x20f   :  { %v65_v10 = vpop.xlane.xlu2 %64 }
 0x210   :  { %v264_v11 = vpop.eup %263  ;;  %v66_v12 = vrot.slane %v65_v10, 4 }
 0x211   :  { %v153_v13 = vmul.f32 %v264_v11, %v151_v7  ;;  %vm158_vm13 = vweird.f32 %v264_v11 }
 0x212   :  { %v67_v14 = vadd.f32 %v66_v12, %v65_v10  ;;  %vm159_vm15 = vmor %vm157_vm14, %vm158_vm13 }
 0x213   :  { %v154_v15 = vsub.f32 1.0, %v153_v13 }
 0x214   :  { %v68_v17 = vrot.slane %v67_v14, 2 }
 0x215   :  { %v155_v19 = vmul.f32 %v264_v11, %v154_v15 }
 0x216   :  { %v69_v21 = vadd.f32 %v68_v17, %v67_v14 }
 0x217   :  { %v156_v22 = vadd.f32 %v264_v11, %v155_v19  ;;  %v147_v28 = vpop.xlane.xlu2 %146 }
 0x218   :  { %v70_v25 = vrot.slane %v69_v21, 1 }
 0x219   :  { %v160_v26 = vsel %vm159_vm15, %v264_v11, %v156_v22 }
 0x21a   :  { %v165_v27 = vsel %vm162_vm0, %v164_v24, %v160_v26  ;;  %v71_v29 = vadd.f32 %v70_v25, %v69_v21 }
 0x21b   :  { %v166_v30 = vmul.f32 %v165_v27, %v147_v28 }
 0x21c   :  { %239 = vpush %v71_v29 }
 0x21d   :  { %v167_v32 = vadd.f32 1e-08, %v166_v30  ;;  %241 = vpush %v180_v31 }
 0x21f   :  { %265 = vlog2.f32 %v167_v32 }
 0x225   :  { %v266_v33 = vpop.eup %265 }
 0x226   :  { %v169_v34 = vmul.f32 0.6931472, %v266_v33 }
 0x228   :  { %v170_v35 = vsub.f32 0.0, %v169_v34 }
 0x22a   :  { %v171_v36 = vmul.f32 %v333_v43, %v170_v35 }
 0x22c   :  { %v182_v37 = vsel %vm45_vm8, %v171_v36, 0.0 }
 0x22d   :  { %183 = vadd.xlane.f32.xlu0 %v182_v37 }
 0x24d   :  { %s345_s3 = spop %239 }
 0x24e   :  { %s242_s21 = spop %241  ;;  %s73_s24 = smul.f32 0.125, %s345_s3 }
 0x24f   :  { %s192_s22 = sadd.f32 1e-08, %s242_s21 }
 0x250   :  { %s212_s6 = smul.f32 0.1, %s73_s24 }
 0x251   :  { %v193_v38 = vstv %s192_s22 }
 0x252   :  { %267 = vrcp.f32 %v193_v38  ;;  %v205_v49 = vand.u32 2147483648, %v193_v38  ;;  %vm199_vm2 = vweird.f32 %v193_v38  ;;  %v203_v50 = vand.u32 2147483647, %v193_v38 }
 0x254   :  { %v206_v54 = vor.u32 1.1754944e-38, %v205_v49  ;;  %vm204_vm4 = vcmp.eq.f32.partialorder %v203_v50, 8.507059e+37 }
 0x258   :  { %v268_v39 = vpop.eup %267 }
 0x259   :  { %v195_v40 = vmul.f32 %v268_v39, %v193_v38  ;;  %vm200_vm1 = vweird.f32 %v268_v39 }
 0x25a   :  { %vm201_vm3 = vmor %vm199_vm2, %vm200_vm1 }
 0x25b   :  { %v196_v41 = vsub.f32 1.0, %v195_v40 }
 0x25d   :  { %v197_v45 = vmul.f32 %v268_v39, %v196_v41 }
 0x25f   :  { %v198_v43 = vadd.f32 %v268_v39, %v197_v45 }
 0x261   :  { %v202_v52 = vsel %vm201_vm3, %v268_v39, %v198_v43 }
 0x262   :  { %v207_v55 = vsel %vm204_vm4, %v206_v54, %v202_v52 }
 0x2a0   :  { %v184_v42 = vpop.xlane.xlu0 %183 }
 0x2a1   :  { %v185_v44 = vrot.slane %v184_v42, 4 }
 0x2a3   :  { %v186_v46 = vadd.f32 %v185_v44, %v184_v42 }
 0x2a5   :  { %v187_v47 = vrot.slane %v186_v46, 2 }
 0x2a7   :  { %v188_v48 = vadd.f32 %v187_v47, %v186_v46 }
 0x2a9   :  { %v189_v51 = vrot.slane %v188_v48, 1 }
 0x2ab   :  { %v190_v53 = vadd.f32 %v189_v51, %v188_v48 }
 0x2ad   :  { %243 = vpush %v190_v53 }
 0x2ae   :  { %245 = vpush %v207_v55 }
 0x2de   :  { %s244_s23 = spop %243 }
 0x2df   :  { %s246_s25 = spop %245 }
 0x2e0   :  { %s209_s26 = smul.f32 %s246_s25, %s244_s23 }
 0x2e2   :  { %s210_s28 = smul.f32 0.05, %s209_s26 }
 0x2e4   :  { %s211_s7 = sadd.f32 %s210_s28, %s56_s27 }
 0x2e6   :  { %s213_s8 = sadd.f32 %s212_s6, %s211_s7 }
 0x2e8   :  { %215 = sst [smem:[#allocation2]] %s213_s8 }
 0x2e9   :  { %224 = dma.smem_to_hbm %s285_s9, 16, %s222_s5, [#allocation3]  }
 0x2ea   :  { %281 = dma.done.wait [#allocation3], 16  }
 0x2eb   :  { %282 = vsyncadd [#allocation3], 4294967280 }
 0x2ec   :  { %229 = sfence }
 0x2ed   :  { %230 = vsyncpa [#allocation3], 1 }

</bundles_post_ra>
